<compile_context>
chip_gen: v7x
topology: tpu7x:2x2x1
jax: 0.10.0
libtpu: 0.0.40
codegen_flags: <defaults>
</compile_context>

<pallas_src>
import functools

import jax
import jax.numpy as jnp
from jax.experimental import pallas as pl
from jax.experimental.pallas import tpu as pltpu


def _round_up(x, m):
    return ((x + m - 1) // m) * m


def _f1_partial_kernel(yt_ref, yp_ref, tp_ref, syp_ref, syt_ref, *,
                       batch, steps_per_split, needs_mask):
    """Accumulate per-class tp / sum(y_pred) / sum(y_true) partials for one split.

    Accumulators are (8, C) sublane-group partials held resident in the output
    block across the inner ("arbitrary") grid axis; the 8->1 sublane reduce and
    the F1 epilogue run once in a separate tiny finalize kernel.
    """
    s = pl.program_id(0)          # partial-sum split (parallel -> one per v7x TC)
    i = pl.program_id(1)          # batch-tile step within the split (arbitrary)
    tb, c = yt_ref.shape

    yt = yt_ref[...].astype(jnp.float32)      # upcast in-register (bf16 reads ok)
    yp = yp_ref[...].astype(jnp.float32)

    if needs_mask:
        # Logical (unclamped) tile index: ragged-tail rows and fully redundant
        # (clamped) tiles both mask to zero. Use where (not multiply) so any
        # garbage in the out-of-bounds block padding (possibly NaN) is killed.
        t = s * steps_per_split + i
        row = t * tb + jax.lax.broadcasted_iota(jnp.int32, (tb, 1), 0)
        valid = row < batch
        yt = jnp.where(valid, yt, 0.0)
        yp = jnp.where(valid, yp, 0.0)

    g = tb // 8
    # Reduce sublane-groups only (vreg-wise VPU adds); no XLU work in the hot loop.
    tp_part = jnp.sum((yt * yp).reshape(g, 8, c), axis=0)    # (8, C)
    syp_part = jnp.sum(yp.reshape(g, 8, c), axis=0)
    syt_part = jnp.sum(yt.reshape(g, 8, c), axis=0)

    @pl.when(i == 0)
    def _init():
        tp_ref[...] = tp_part
        syp_ref[...] = syp_part
        syt_ref[...] = syt_part

    @pl.when(i > 0)
    def _acc():
        tp_ref[...] += tp_part
        syp_ref[...] += syp_part
        syt_ref[...] += syt_part


def _f1_finalize_kernel(tp_ref, syp_ref, syt_ref, o_ref, *, num_classes, epsilon):
    """Combine split / sublane partials and compute the scalar F1 loss."""
    tp = jnp.sum(jnp.sum(tp_ref[...], axis=0), axis=0, keepdims=True)    # (1, C)
    syp = jnp.sum(jnp.sum(syp_ref[...], axis=0), axis=0, keepdims=True)  # sum y_pred
    syt = jnp.sum(jnp.sum(syt_ref[...], axis=0), axis=0, keepdims=True)  # sum y_true
    # tp + fp == sum(y_pred), tp + fn == sum(y_true); fp/fn never materialized.
    precision = tp / (syp + epsilon)
    recall = tp / (syt + epsilon)
    f1 = 2.0 * (precision * recall) / (precision + recall + epsilon)
    f1 = jnp.clip(f1, epsilon, 1.0 - epsilon)
    mean_f1 = jnp.sum(f1, axis=1, keepdims=True) / float(num_classes)    # (1, 1)
    o_ref[...] = jnp.broadcast_to(1.0 - mean_f1, o_ref.shape)


def f1_loss(y_pred, y_true, epsilon=1e-7, block_batch=2048, num_splits=2):
    """y_pred, y_true: (B, C). Returns scalar float32 loss (matches F1_Loss.forward)."""
    assert y_pred.ndim == 2 and y_true.shape == y_pred.shape
    B, C = y_pred.shape

    # Floating inputs stream in their native dtype (bf16 halves DMA bytes of this
    # memory-bound kernel); only integer / bool labels get a host cast.
    if not jnp.issubdtype(y_pred.dtype, jnp.floating):
        y_pred = y_pred.astype(jnp.float32)
    if not jnp.issubdtype(y_true.dtype, jnp.floating):
        y_true = y_true.astype(jnp.float32)
    it_yp = jnp.dtype(y_pred.dtype).itemsize
    it_yt = jnp.dtype(y_true.dtype).itemsize

    # Batch-tile rows: multiple of the packed sublane count of the narrowest dtype.
    row_align = max(8, 32 // min(it_yp, it_yt))

    # Tile as large as possible under an explicit budget that fits v5e's 16 MiB
    # scoped-VMEM default (2 inputs x 2 pipeline buffers), so large C stays safe.
    budget = 12 * 1024 * 1024
    per_row = 2 * C * (it_yp + it_yt)
    tb_cap = max(row_align, (budget // max(per_row, 1)) // row_align * row_align)
    tb = max(row_align, min(_round_up(block_batch, row_align), tb_cap,
                            _round_up(B, row_align)))

    num_tiles = pl.cdiv(B, tb)
    splits = max(1, min(num_splits, num_tiles))     # 2-way partials -> both v7x TCs
    steps = pl.cdiv(num_tiles, splits)
    needs_mask = (B % tb != 0) or (splits * steps != num_tiles)

    if splits * steps == num_tiles:
        def in_index(s, i):
            return (s * steps + i, 0)
    else:
        # Ragged tile count: clamp redundant grid steps onto the last tile; the
        # in-kernel row mask (computed from the unclamped index) zeroes them out.
        def in_index(s, i):
            return (jnp.minimum(s * steps + i, num_tiles - 1), 0)

    part_shape = jax.ShapeDtypeStruct((splits, 8, C), jnp.float32)
    out_spec = pl.BlockSpec((None, 8, C), lambda s, i: (s, 0, 0))

    cost = pl.CostEstimate(
        flops=int(4 * B * C) + 16 * C,
        transcendentals=0,
        bytes_accessed=int(B * C * (it_yp + it_yt) + 3 * splits * 8 * C * 4),
    )
    vmem_limit = int(min(32 * 1024 * 1024,
                         max(4 * 1024 * 1024, 3 * tb * C * (it_yp + it_yt))))

    tp_p, syp_p, syt_p = pl.pallas_call(
        functools.partial(_f1_partial_kernel, batch=B, steps_per_split=steps,
                          needs_mask=needs_mask),
        out_shape=(part_shape, part_shape, part_shape),
        grid=(splits, steps),
        in_specs=[pl.BlockSpec((tb, C), in_index),      # y_true tiles
                  pl.BlockSpec((tb, C), in_index)],     # y_pred tiles
        out_specs=(out_spec, out_spec, out_spec),
        compiler_params=pltpu.CompilerParams(
            dimension_semantics=("parallel", "arbitrary"),
            vmem_limit_bytes=vmem_limit),
        cost_estimate=cost,
    )(y_true, y_pred)

    out = pl.pallas_call(
        functools.partial(_f1_finalize_kernel, num_classes=C, epsilon=float(epsilon)),
        out_shape=jax.ShapeDtypeStruct((1, 128), jnp.float32),
    )(tp_p, syp_p, syt_p)
    return out[0, 0]


def f1_loss_ref(y_pred, y_true, epsilon=1e-7):
    """Pure-JAX reference mirroring the PyTorch forward exactly."""
    y_pred = y_pred.astype(jnp.float32)
    y_true = y_true.astype(jnp.float32)
    tp = (y_true * y_pred).sum(axis=0)
    fp = ((1.0 - y_true) * y_pred).sum(axis=0)
    fn = (y_true * (1.0 - y_pred)).sum(axis=0)
    precision = tp / (tp + fp + epsilon)
    recall = tp / (tp + fn + epsilon)
    f1 = 2.0 * (precision * recall) / (precision + recall + epsilon)
    f1 = jnp.clip(f1, epsilon, 1.0 - epsilon)
    return 1.0 - f1.mean()


if __name__ == "__main__":
    key = jax.random.PRNGKey(0)
    k1, k2, k3, k4 = jax.random.split(key, 4)

    # Test 1: multi-tile, 2-way split (grid (2, 2)), fully aligned (no mask path).
    B, C = 256, 10
    y_pred = jax.nn.sigmoid(jax.random.normal(k1, (B, C), dtype=jnp.float32))
    y_true = (jax.random.uniform(k2, (B, C)) > 0.5).astype(jnp.float32)
    loss = jax.block_until_ready(f1_loss(y_pred, y_true, block_batch=64))
    ref = f1_loss_ref(y_pred, y_true)
    assert loss.shape == ()
    assert abs(float(loss) - float(ref)) < 1e-5, (loss, ref)

    # Test 2: ragged batch (in-kernel row mask), single tile / single split.
    B2, C2 = 37, 5
    yp2 = jax.nn.sigmoid(jax.random.normal(k3, (B2, C2), dtype=jnp.float32))
    yt2 = (jax.random.uniform(k4, (B2, C2)) > 0.5).astype(jnp.float32)
    l2 = jax.block_until_ready(f1_loss(yp2, yt2))
    r2 = f1_loss_ref(yp2, yt2)
    assert abs(float(l2) - float(r2)) < 1e-5, (l2, r2)

    # Test 3: ragged + non-divisible tile count (clamped redundant grid step).
    B3, C3 = 300, 10
    yp3 = jax.nn.sigmoid(jax.random.normal(k1, (B3, C3), dtype=jnp.float32))
    yt3 = (jax.random.uniform(k2, (B3, C3)) > 0.5).astype(jnp.float32)
    l3 = jax.block_until_ready(f1_loss(yp3, yt3, block_batch=128))
    r3 = f1_loss_ref(yp3, yt3)
    assert abs(float(l3) - float(r3)) < 1e-5, (l3, r3)

    # Test 4: bf16 predictions streamed directly (no host upcast), f32 accumulation.
    yp4 = yp3.astype(jnp.bfloat16)
    l4 = jax.block_until_ready(f1_loss(yp4, yt3, block_batch=128))
    r4 = f1_loss_ref(yp4, yt3)
    assert abs(float(l4) - float(r4)) < 2e-5, (l4, r4)

    print("KERNEL_OK")
</pallas_src>

<mosaic_0001>
module attributes {stable_mosaic.version = 11 : i64} {
  func.func @_f1_partial_kernel(%arg0: i32, %arg1: i32, %arg2: memref<64x10xf32, #tpu.memory_space<vmem>>, %arg3: memref<64x10xf32, #tpu.memory_space<vmem>>, %arg4: memref<1x8x10xf32, #tpu.memory_space<vmem>>, %arg5: memref<1x8x10xf32, #tpu.memory_space<vmem>>, %arg6: memref<1x8x10xf32, #tpu.memory_space<vmem>>) attributes {dimension_semantics = [#tpu.dimension_semantics<parallel>, #tpu.dimension_semantics<arbitrary>], iteration_bounds = array<i64: 2, 2>, scalar_prefetch = 0 : i64, scratch_operands = 0 : i64, tpu.core_type = #tpu.core_type<tc>, window_params = [{transform_indices = @transform_0, window_bounds = array<i64: 64, 10>}, {transform_indices = @transform_1, window_bounds = array<i64: 64, 10>}, {transform_indices = @transform_2, window_bounds = array<i64: 1, 8, 10>}, {transform_indices = @transform_3, window_bounds = array<i64: 1, 8, 10>}, {transform_indices = @transform_4, window_bounds = array<i64: 1, 8, 10>}]} {
    %c0 = arith.constant 0 : index
    %c0_0 = arith.constant 0 : index
    %0 = vector.load %arg2[%c0, %c0_0] : memref<64x10xf32, #tpu.memory_space<vmem>>, vector<64x10xf32>
    %c0_1 = arith.constant 0 : index
    %c0_2 = arith.constant 0 : index
    %1 = vector.load %arg3[%c0_1, %c0_2] : memref<64x10xf32, #tpu.memory_space<vmem>>, vector<64x10xf32>
    %2 = arith.mulf %0, %1 : vector<64x10xf32>
    %3 = vector.shape_cast %2 : vector<64x10xf32> to vector<8x8x10xf32>
    %cst = arith.constant dense<0.000000e+00> : vector<8x10xf32>
    %4 = vector.multi_reduction <add>, %3, %cst [0] : vector<8x8x10xf32> to vector<8x10xf32>
    %5 = vector.shape_cast %1 : vector<64x10xf32> to vector<8x8x10xf32>
    %cst_3 = arith.constant dense<0.000000e+00> : vector<8x10xf32>
    %6 = vector.multi_reduction <add>, %5, %cst_3 [0] : vector<8x8x10xf32> to vector<8x10xf32>
    %7 = vector.shape_cast %0 : vector<64x10xf32> to vector<8x8x10xf32>
    %cst_4 = arith.constant dense<0.000000e+00> : vector<8x10xf32>
    %8 = vector.multi_reduction <add>, %7, %cst_4 [0] : vector<8x8x10xf32> to vector<8x10xf32>
    %c0_i32 = arith.constant 0 : i32
    %9 = arith.cmpi eq, %arg1, %c0_i32 : i32
    %10 = arith.extui %9 : i1 to i32
    %c0_i32_5 = arith.constant 0 : i32
    %11 = arith.cmpi ne, %10, %c0_i32_5 : i32
    scf.if %11 {
      %c0_8 = arith.constant 0 : index
      %c0_9 = arith.constant 0 : index
      %c0_10 = arith.constant 0 : index
      %15 = vector.load %arg4[%c0_8, %c0_9, %c0_10] : memref<1x8x10xf32, #tpu.memory_space<vmem>>, vector<1x8x10xf32>
      %16 = vector.shape_cast %15 : vector<1x8x10xf32> to vector<8x10xf32>
      %17 = vector.shape_cast %4 : vector<8x10xf32> to vector<1x8x10xf32>
      tpu.vector_store %arg4[%c0_8, %c0_9, %c0_10], %17 {strides = array<i32>} : memref<1x8x10xf32, #tpu.memory_space<vmem>>, vector<1x8x10xf32>,
      %c0_11 = arith.constant 0 : index
      %c0_12 = arith.constant 0 : index
      %c0_13 = arith.constant 0 : index
      %18 = vector.load %arg5[%c0_11, %c0_12, %c0_13] : memref<1x8x10xf32, #tpu.memory_space<vmem>>, vector<1x8x10xf32>
      %19 = vector.shape_cast %18 : vector<1x8x10xf32> to vector<8x10xf32>
      %20 = vector.shape_cast %6 : vector<8x10xf32> to vector<1x8x10xf32>
      tpu.vector_store %arg5[%c0_11, %c0_12, %c0_13], %20 {strides = array<i32>} : memref<1x8x10xf32, #tpu.memory_space<vmem>>, vector<1x8x10xf32>,
      %c0_14 = arith.constant 0 : index
      %c0_15 = arith.constant 0 : index
      %c0_16 = arith.constant 0 : index
      %21 = vector.load %arg6[%c0_14, %c0_15, %c0_16] : memref<1x8x10xf32, #tpu.memory_space<vmem>>, vector<1x8x10xf32>
      %22 = vector.shape_cast %21 : vector<1x8x10xf32> to vector<8x10xf32>
      %23 = vector.shape_cast %8 : vector<8x10xf32> to vector<1x8x10xf32>
      tpu.vector_store %arg6[%c0_14, %c0_15, %c0_16], %23 {strides = array<i32>} : memref<1x8x10xf32, #tpu.memory_space<vmem>>, vector<1x8x10xf32>,
    } else {
    }
    %c0_i32_6 = arith.constant 0 : i32
    %12 = arith.cmpi sgt, %arg1, %c0_i32_6 : i32
    %13 = arith.extui %12 : i1 to i32
    %c0_i32_7 = arith.constant 0 : i32
    %14 = arith.cmpi ne, %13, %c0_i32_7 : i32
    scf.if %14 {
      %c0_8 = arith.constant 0 : index
      %c0_9 = arith.constant 0 : index
      %c0_10 = arith.constant 0 : index
      %15 = vector.load %arg4[%c0_8, %c0_9, %c0_10] : memref<1x8x10xf32, #tpu.memory_space<vmem>>, vector<1x8x10xf32>
      %16 = vector.shape_cast %15 : vector<1x8x10xf32> to vector<8x10xf32>
      %17 = arith.addf %16, %4 : vector<8x10xf32>
      %c0_11 = arith.constant 0 : index
      %c0_12 = arith.constant 0 : index
      %c0_13 = arith.constant 0 : index
      %18 = vector.load %arg4[%c0_11, %c0_12, %c0_13] : memref<1x8x10xf32, #tpu.memory_space<vmem>>, vector<1x8x10xf32>
      %19 = vector.shape_cast %18 : vector<1x8x10xf32> to vector<8x10xf32>
      %20 = vector.shape_cast %17 : vector<8x10xf32> to vector<1x8x10xf32>
      tpu.vector_store %arg4[%c0_11, %c0_12, %c0_13], %20 {strides = array<i32>} : memref<1x8x10xf32, #tpu.memory_space<vmem>>, vector<1x8x10xf32>,
      %c0_14 = arith.constant 0 : index
      %c0_15 = arith.constant 0 : index
      %c0_16 = arith.constant 0 : index
      %21 = vector.load %arg5[%c0_14, %c0_15, %c0_16] : memref<1x8x10xf32, #tpu.memory_space<vmem>>, vector<1x8x10xf32>
      %22 = vector.shape_cast %21 : vector<1x8x10xf32> to vector<8x10xf32>
      %23 = arith.addf %22, %6 : vector<8x10xf32>
      %c0_17 = arith.constant 0 : index
      %c0_18 = arith.constant 0 : index
      %c0_19 = arith.constant 0 : index
      %24 = vector.load %arg5[%c0_17, %c0_18, %c0_19] : memref<1x8x10xf32, #tpu.memory_space<vmem>>, vector<1x8x10xf32>
      %25 = vector.shape_cast %24 : vector<1x8x10xf32> to vector<8x10xf32>
      %26 = vector.shape_cast %23 : vector<8x10xf32> to vector<1x8x10xf32>
      tpu.vector_store %arg5[%c0_17, %c0_18, %c0_19], %26 {strides = array<i32>} : memref<1x8x10xf32, #tpu.memory_space<vmem>>, vector<1x8x10xf32>,
      %c0_20 = arith.constant 0 : index
      %c0_21 = arith.constant 0 : index
      %c0_22 = arith.constant 0 : index
      %27 = vector.load %arg6[%c0_20, %c0_21, %c0_22] : memref<1x8x10xf32, #tpu.memory_space<vmem>>, vector<1x8x10xf32>
      %28 = vector.shape_cast %27 : vector<1x8x10xf32> to vector<8x10xf32>
      %29 = arith.addf %28, %8 : vector<8x10xf32>
      %c0_23 = arith.constant 0 : index
      %c0_24 = arith.constant 0 : index
      %c0_25 = arith.constant 0 : index
      %30 = vector.load %arg6[%c0_23, %c0_24, %c0_25] : memref<1x8x10xf32, #tpu.memory_space<vmem>>, vector<1x8x10xf32>
      %31 = vector.shape_cast %30 : vector<1x8x10xf32> to vector<8x10xf32>
      %32 = vector.shape_cast %29 : vector<8x10xf32> to vector<1x8x10xf32>
      tpu.vector_store %arg6[%c0_23, %c0_24, %c0_25], %32 {strides = array<i32>} : memref<1x8x10xf32, #tpu.memory_space<vmem>>, vector<1x8x10xf32>,
    } else {
    }
    return
  }
  func.func @transform_0(%arg0: i32, %arg1: i32) -> (i32, i32) {
    %c2_i32 = arith.constant 2 : i32
    %0 = arith.muli %arg0, %c2_i32 : i32
    %1 = arith.addi %0, %arg1 : i32
    %c0_i32 = arith.constant 0 : i32
    %c0_i32_0 = arith.constant 0 : i32
    return %1, %c0_i32 : i32, i32
  }
  func.func @transform_1(%arg0: i32, %arg1: i32) -> (i32, i32) {
    %c2_i32 = arith.constant 2 : i32
    %0 = arith.muli %arg0, %c2_i32 : i32
    %1 = arith.addi %0, %arg1 : i32
    %c0_i32 = arith.constant 0 : i32
    %c0_i32_0 = arith.constant 0 : i32
    return %1, %c0_i32 : i32, i32
  }
  func.func @transform_2(%arg0: i32, %arg1: i32) -> (i32, i32, i32) {
    %c0_i32 = arith.constant 0 : i32
    %c0_i32_0 = arith.constant 0 : i32
    %c0_i32_1 = arith.constant 0 : i32
    return %arg0, %c0_i32, %c0_i32_0 : i32, i32, i32
  }
  func.func @transform_3(%arg0: i32, %arg1: i32) -> (i32, i32, i32) {
    %c0_i32 = arith.constant 0 : i32
    %c0_i32_0 = arith.constant 0 : i32
    %c0_i32_1 = arith.constant 0 : i32
    return %arg0, %c0_i32, %c0_i32_0 : i32, i32, i32
  }
  func.func @transform_4(%arg0: i32, %arg1: i32) -> (i32, i32, i32) {
    %c0_i32 = arith.constant 0 : i32
    %c0_i32_0 = arith.constant 0 : i32
    %c0_i32_1 = arith.constant 0 : i32
    return %arg0, %c0_i32, %c0_i32_0 : i32, i32, i32
  }
}

</mosaic_0001>

<bundles_post_ra>
// kernel: tpu_custom_call.1
= control target key start
LH: loop header
LB: loop body
LE: loop exit
PB: predicated region body
PF: predicated region fallthrough
CT: control target
= control target key end

     0   :  { %s1134_s0 = inlined_call_operand.vmem [shape: f32[256,10], index: 0, kind: input, shape index: {}]   ;;  %s1135_s1 = inlined_call_operand.vmem [shape: f32[256,10], index: 1, kind: input, shape index: {}]   ;;  %s1136_s2 = inlined_call_operand.hbm [shape: f32[2,8,10], index: 2, kind: output, shape index: {0}]   ;;  %s1137_s3 = inlined_call_operand.hbm [shape: f32[2,8,10], index: 3, kind: output, shape index: {1}]   ;;  %s1138_s4 = inlined_call_operand.hbm [shape: f32[2,8,10], index: 4, kind: output, shape index: {2}]  }
   0x1   :  { %1141 = sst [smem:[#allocation9_spill]] %s1134_s0 }
   0x2   :  { %10 = vsyncpa [#allocation3], 0 }
   0x3   :  { %12 = vsyncpa [#allocation3 + $0x1], 0 }
   0x4   :  { %13 = vsyncpa [#allocation5], 0 }
   0x5   :  { %15 = vsyncpa [#allocation5 + $0x1], 0  ;;  %s854_s15 = smov 0   ;;  %s856_s16 = smov 0  }
   0x6   :  { %s858_s17 = smov 0   ;;  %s860_s18 = smov 0  }
   0x7   :  { %s862_s19 = smov 0   ;;  %s864_s20 = smov 0  }
   0x8   :  { %s866_s21 = smov 0   ;;  %s868_s22 = smov 0  }
   0x9 LB: > { %s561_s23 = sadd.s32 4294967295, %s824_s22   ;;  %s1139_s24 = sadd.s32 4294967294, %s824_s22   ;;  %s824_s22 = sphi %s868_s22, %s21_s22   ;;  %s820_s21 = sphi %s866_s21, %s1155_s21   ;;  %s816_s20 = sphi %s864_s20, %s1154_s20   ;;  %s812_s19 = sphi %s862_s19, %s1153_s19   ;;  %s808_s18 = sphi %s860_s18, %s1152_s18   ;;  %s804_s17 = sphi %s858_s17, %s1151_s17   ;;  %s800_s16 = sphi %s856_s16, %s1150_s16   ;;  %s796_s15 = sphi %s854_s15, %s1149_s15  }
   0xa   : > { %s30_s25 = sadd.s32 1, %s816_s20  ;;  %s33_s26 = sadd.s32 1, %s820_s21 }
   0xb   : > { %p31_p0 = scmp.ge.s32.totalorder %s30_s25, 2  ;;  %p110_p1 = scmp.ne.s32.totalorder %s804_s17, %s800_s16 }
   0xc   : > { %p111_p2 = scmp.eq.s32.totalorder %s561_s23, 3  ;;  %p116_p4 = scmp.ne.s32.totalorder %s800_s16, %s796_s15 }
   0xd   : > { %s1157_s25 = smov (%p31_p0, %s30_s25), 0  ;;  %s1159_s26 = smov (!%p31_p0, %s33_s26), %s820_s21 }
   0xe   : > { %p905_p3 = por %p111_p2, %p110_p1  ;;  %p35_p5 = scmp.ge.s32.totalorder %s1159_s26, 2 }
   0xf   : > { %p117_p6 = scmp.eq.s32.totalorder %s1139_s24, 3  ;;  %p569_p7 = scmp.ge.s32.totalorder %s824_s22, 1 }
  0x10   : > { %p213_p8 = scmp.lt.s32.totalorder %s824_s22, 5  ;;  %s1161_s26 = smov (%p35_p5, %s1159_s26), 0 }
  0x11   : > { %p917_p9 = por %p117_p6, %p116_p4  ;;  %s97_s29 = ssub.s32 %s820_s21, %s1161_s26 }
  0x12   : > { %p214_p10 = pnand %p569_p7, %p213_p8  ;;  %s100_s30 = sadd.s32 1, %s804_s17 }
  0x13   : > { %p98_p11 = scmp.eq.s32.totalorder %s97_s29, 0  ;;  %s1140_s6 = sand.u32 (!%p214_p10), 1, %s800_s16   ;;  %vm302_vm0 = vcmask (!%p214_p10), 80896  }
  0x14   : > { %217 = sbr.rel (%p214_p10) target bundleno = 136 (0x88), region = 28  ;;  %s573_s7 = sshll.u32 (!%p214_p10), %s812_s19, 1 }
  0x15   : > { %s925_s5 = scalar_select %p98_p11, %s804_s17, %s100_s30  }
  0x16   : > { %s931_s8 = sshll.u32 (!%p214_p10), %s1140_s6, 3  ;;  %s259_s9 = sadd.s32 (!%p214_p10), %s808_s18, %s573_s7 }
  0x17   : > { %s574_s10 = sshll.u32 (!%p214_p10), %s259_s9, 3  ;;  %s1144_s0 = sld [smem:[#allocation9_spill]] (!%p214_p10) }
  0x18   : > { %p261_p12 = scmp.lt.s32.totalorder (!%p214_p10), %s574_s10, 31  ;;  %s250_s7 = scalar_lea.vmem (!%p214_p10), [#allocation4], %s931_s8 }
  0x19   : > { %s989_s9 = scalar_lea.vmem (!%p214_p10), [#allocation6], %s931_s8  ;;  %p579_p13 = scmp.ne.s32.totalorder (!%p214_p10), %s808_s18, 0 }
  0x1b   : > { %s1163_s10 = smov (!%p261_p12, %s574_s10), 31 }
  0x1c   : > { %s575_s11 = sshll.u32 %s1163_s10, 3 }
  0x1d   : > { %s937_s14 = scalar_lea.vmem %s1144_s0, %s575_s11  ;;  %s942_s24 = scalar_lea.vmem %s1135_s1, %s575_s11 }
  0x1e   : > { %v278_v0 = vld [vmem:[%s937_s14] sm:$0xff]  ;;  %v279_v1 = vld [vmem:[%s937_s14 + $0x8] sm:$0xff]  ;;  %v280_v2 = vld [vmem:[%s937_s14 + $0x10] sm:$0xff] }
  0x1f   : > { %v281_v3 = vld [vmem:[%s937_s14 + $0x18] sm:$0xff]  ;;  %v282_v4 = vld [vmem:[%s937_s14 + $0x20] sm:$0xff]  ;;  %v287_v6 = vld [vmem:[%s942_s24 + $0x8] sm:$0xff]  ;;  %v333_v10 = vsel %vm302_vm0, %v278_v0, 0.0  ;;  %v334_v11 = vsel %vm302_vm0, %v279_v1, 0.0  ;;  %v336_v28 = vsel %vm302_vm0, %v280_v2, 0.0 }
  0x20   : > { %v286_v5 = vld [vmem:[%s942_s24] sm:$0xff]  ;;  %v288_v7 = vld [vmem:[%s942_s24 + $0x10] sm:$0xff]  ;;  %v289_v8 = vld [vmem:[%s942_s24 + $0x18] sm:$0xff]  ;;  %v295_v13 = vmul.f32 %v287_v6, %v279_v1  ;;  %v319_v20 = vsel %vm302_vm0, %v287_v6, 0.0  ;;  %v335_v24 = vadd.f32 %v334_v11, %v333_v10  ;;  %v338_v37 = vsel %vm302_vm0, %v281_v3, 0.0 }
  0x21   : > { %v294_v9 = vmul.f32 %v286_v5, %v278_v0  ;;  %v290_v12 = vld [vmem:[%s942_s24 + $0x20] sm:$0xff]  ;;  %v296_v14 = vmul.f32 %v288_v7, %v280_v2  ;;  %v297_v15 = vmul.f32 %v289_v8, %v281_v3  ;;  %v283_v16 = vld [vmem:[%s937_s14 + $0x28] sm:$0xff]  ;;  %v318_v19 = vsel %vm302_vm0, %v286_v5, 0.0  ;;  %v284_v25 = vld [vmem:[%s937_s14 + $0x30] sm:$0xff] }
  0x22   : > { %v291_v17 = vld [vmem:[%s942_s24 + $0x28] sm:$0xff]  ;;  %v298_v21 = vmul.f32 %v290_v12, %v282_v4  ;;  %v304_v22 = vsel %vm302_vm0, %v295_v13, 0.0  ;;  %v292_v26 = vld [vmem:[%s942_s24 + $0x30] sm:$0xff]  ;;  %v320_v31 = vadd.f32 %v319_v20, %v318_v19  ;;  %v321_v32 = vsel %vm302_vm0, %v288_v7, 0.0  ;;  %v285_v33 = vld [vmem:[%s937_s14 + $0x38] sm:$0xff] }
  0x23   : > { %v303_v18 = vsel %vm302_vm0, %v294_v9, 0.0  ;;  %v306_v23 = vsel %vm302_vm0, %v296_v14, 0.0  ;;  %v299_v29 = vmul.f32 %v291_v17, %v283_v16  ;;  %v308_v30 = vsel %vm302_vm0, %v297_v15, 0.0  ;;  %v293_v34 = vld [vmem:[%s942_s24 + $0x38] sm:$0xff]  ;;  %s985_s24 = scalar_lea.vmem [#allocation2], %s931_s8 }
  0x24   : > { %v305_v27 = vadd.f32 %v304_v22, %v303_v18  ;;  %v323_v36 = vsel %vm302_vm0, %v289_v8, 0.0  ;;  %v300_v38 = vmul.f32 %v292_v26, %v284_v25  ;;  %v310_v39 = vsel %vm302_vm0, %v298_v21, 0.0 }
  0x25   : > { %v322_v40 = vadd.f32 %v321_v32, %v320_v31  ;;  %v337_v41 = vadd.f32 %v336_v28, %v335_v24  ;;  %v325_v43 = vsel %vm302_vm0, %v290_v12, 0.0  ;;  %v340_v44 = vsel %vm302_vm0, %v282_v4, 0.0 }
  0x26   : > { %v307_v35 = vadd.f32 %v306_v23, %v305_v27  ;;  %v301_v45 = vmul.f32 %v293_v34, %v285_v33  ;;  %v312_v46 = vsel %vm302_vm0, %v299_v29, 0.0  ;;  %v327_v50 = vsel %vm302_vm0, %v291_v17, 0.0 }
  0x27   : > { %v324_v47 = vadd.f32 %v323_v36, %v322_v40  ;;  %v339_v48 = vadd.f32 %v338_v37, %v337_v41  ;;  %v342_v51 = vsel %vm302_vm0, %v283_v16, 0.0  ;;  %v314_v52 = vsel %vm302_vm0, %v300_v38, 0.0 }
  0x28   : > { %v309_v42 = vadd.f32 %v308_v30, %v307_v35  ;;  %v329_v56 = vsel %vm302_vm0, %v292_v26, 0.0  ;;  %v344_v57 = vsel %vm302_vm0, %v284_v25, 0.0  ;;  %v316_v58 = vsel %vm302_vm0, %v301_v45, 0.0 }
  0x29   : > { %v326_v53 = vadd.f32 %v325_v43, %v324_v47  ;;  %v341_v54 = vadd.f32 %v340_v44, %v339_v48  ;;  %v331_v62 = vsel %vm302_vm0, %v293_v34, 0.0  ;;  %v346_v63 = vsel %vm302_vm0, %v285_v33, 0.0 }
  0x2a   : > { %v311_v49 = vadd.f32 %v310_v39, %v309_v42  ;;  %351 = sbr.rel (%p579_p13) target bundleno = 51 (0x33), region = 32 }
  0x2b   : > { %v328_v59 = vadd.f32 %v327_v50, %v326_v53  ;;  %v343_v60 = vadd.f32 %v342_v51, %v341_v54 }
  0x2c   : > { %v313_v55 = vadd.f32 %v312_v46, %v311_v49 }
  0x2d   : > { %v330_v0 = vadd.f32 %v329_v56, %v328_v59  ;;  %v345_v1 = vadd.f32 %v344_v57, %v343_v60 }
  0x2e   : > { %v315_v61 = vadd.f32 %v314_v52, %v313_v55 }
  0x2f   : > { %v332_v3 = vadd.f32 %v331_v62, %v330_v0  ;;  %v347_v4 = vadd.f32 %v346_v63, %v345_v1 }
  0x30   : > { %v317_v2 = vadd.f32 %v316_v58, %v315_v61 }
  0x31   : > { %353 = vst.msk [vmem:[%s250_s7] sm:$0xff] %vm302_vm0, %v332_v3  ;;  %354 = vst.msk [vmem:[%s989_s9] sm:$0xff] %vm302_vm0, %v347_v4 }
  0x32   : > { %352 = vst.msk [vmem:[%s985_s24] sm:$0xff] %vm302_vm0, %v317_v2 }
  0x33 PF: > { %p580_p0 = scmp.le.s32.totalorder %s808_s18, 0 }
  0x35   : > { %358 = sbr.rel (%p580_p0) target bundleno = 62 (0x3e), region = 36 }
  0x39   : > { %v359_v5 = vld [vmem:[%s985_s24] sm:$0xff] (!%p580_p0) }
  0x3a   : > { %v362_v6 = vld [vmem:[%s250_s7] sm:$0xff] (!%p580_p0)  ;;  %v365_v7 = vld [vmem:[%s989_s9] sm:$0xff] (!%p580_p0)  ;;  %v360_v8 = vadd.f32 (!%p580_p0), %v359_v5, %v317_v2 }
  0x3b   : > { %v363_v9 = vadd.f32 (!%p580_p0), %v362_v6, %v332_v3  ;;  %v366_v10 = vadd.f32 (!%p580_p0), %v365_v7, %v347_v4 }
  0x3c   : > { %361 = vst.msk [vmem:[%s985_s24] sm:$0xff] %vm302_vm0, %v360_v8 }
  0x3d   : > { %364 = vst.msk [vmem:[%s250_s7] sm:$0xff] %vm302_vm0, %v363_v9  ;;  %367 = vst.msk [vmem:[%s989_s9] sm:$0xff] %vm302_vm0, %v366_v10 }
  0x3e PF: > { %s1007_s18 = sand.u32 1, %s561_s23   ;;  %s1010_s8 = sshll.u32 %s812_s19, 7 }
  0x3f   : > { %s1016_s12 = scalar_lea.hbm %s1137_s3, %s1010_s8  ;;  %s405_s13 = sshll.u32 %s250_s7, 4  ;;  %s1018_s13 = int_to_ptr.vmem [resolvable:$true] %s405_s13 }
  0x40   : > { %s1024_s23 = scalar_lea.hbm %s1136_s2, %s1010_s8  ;;  %s670_s30 = scalar_lea.vmem %s1018_s13, 128 }
  0x41   : > { %p671_p1 = scmp.ne.s32.totalorder %s1018_s13, %s670_s30  ;;  %s826_s10 = smov [#allocation4]  }
  0x42   : > { %s674_s11 = sshll.u32 %s826_s10, 4  ;;  %s675_s11 = int_to_ptr.vmem [resolvable:$false] %s674_s11 }
  0x43   : > { %p672_p2 = pnand %p671_p1, %p905_p3  ;;  %s676_s7 = scalar_lea.vmem %s675_s11, 256 }
  0x44   : > { %p677_p5 = scmp.lt.s32.totalorder %s1018_s13, %s675_s11  ;;  %p678_p6 = scmp.lt.s32.totalorder %s676_s7, %s670_s30 }
  0x45   : > { %p673_p4 = pneg %p672_p2 }
  0x46   : > { %p679_p7 = por %p678_p6, %p677_p5 }
  0x48   : > { %p680_p8 = pnand %p679_p7, %p673_p4 }
  0x4a   : > { %683 = shalt.err (!%p680_p8)
}
  0x4b   : > { %s684_s14 = scalar_lea.hbm %s1016_s12, 128  ;;  %s688_s10 = scalar_lea.hbm %s1137_s3, 256 }
  0x4c   : > { %p685_p10 = scmp.ne.s32.totalorder %s1016_s12, %s684_s14  ;;  %p689_p13 = scmp.lt.u32.totalorder %s1016_s12, %s1137_s3 }
  0x4d   : > { %p690_p0 = scmp.lt.u32.totalorder %s688_s10, %s684_s14  ;;  %p692_p2 = scmp.lt.u32.totalorder %s684_s14, %s1016_s12 }
  0x4e   : > { %p686_p11 = pnand %p685_p10, %p905_p3 }
  0x4f   : > { %p691_p1 = por %p690_p0, %p689_p13 }
  0x50   : > { %p687_p12 = pneg %p686_p11 }
  0x51   : > { %p693_p4 = por %p692_p2, %p691_p1 }
  0x53   : > { %p694_p5 = pnand %p693_p4, %p687_p12 }
  0x55   : > { %697 = shalt.err (!%p694_p5)
}
  0x56   : > { %s1145_s30 = scalar_lea.sflag [#allocation5], %s1007_s18  ;;  %s392_s6 = sshll.u32 %s985_s24, 4  ;;  %s1057_s6 = int_to_ptr.vmem [resolvable:$true] %s392_s6 }
  0x57   : > { %590 = dma.vmem_to_hbm [thread:$0]  (%p905_p3), %s1018_s13, 128, %s1016_s12, %s1145_s30  }
  0x58   : > { %s1055_s14 = scalar_lea.hbm %s1138_s4, %s1010_s8  ;;  %s418_s29 = sshll.u32 %s989_s9, 4  ;;  %s419_s29 = int_to_ptr.vmem [resolvable:$true] %s418_s29 }
  0x59   : > { %s1146_s10 = sand.u32 1, %s800_s16   ;;  %s698_s0 = scalar_lea.vmem %s1057_s6, 128 }
  0x5a   : > { %s369_s11 = scalar_lea.sflag [#allocation3], %s1146_s10  ;;  %p699_p6 = scmp.ne.s32.totalorder %s1057_s6, %s698_s0 }
  0x5b   : > { %s827_s12 = smov [#allocation2]  }
  0x5c   : > { %p700_p7 = pnand %p699_p6, %p905_p3  ;;  %s702_s24 = sshll.u32 %s827_s12, 4  ;;  %s703_s24 = int_to_ptr.vmem [resolvable:$false] %s702_s24 }
  0x5d   : > { %s704_s13 = scalar_lea.vmem %s703_s24, 256  ;;  %p705_p10 = scmp.lt.s32.totalorder %s1057_s6, %s703_s24 }
  0x5e   : > { %p701_p8 = pneg %p700_p7  ;;  %p706_p11 = scmp.lt.s32.totalorder %s704_s13, %s698_s0 }
  0x60   : > { %p707_p12 = por %p706_p11, %p705_p10 }
  0x62   : > { %p708_p13 = pnand %p707_p12, %p701_p8 }
  0x64   : > { %711 = shalt.err (!%p708_p13)
}
  0x65   : > { %s712_s8 = scalar_lea.hbm %s1024_s23, 128  ;;  %s716_s7 = scalar_lea.hbm %s1136_s2, 256 }
  0x66   : > { %p713_p0 = scmp.ne.s32.totalorder %s1024_s23, %s712_s8  ;;  %p717_p4 = scmp.lt.u32.totalorder %s1024_s23, %s1136_s2 }
  0x67   : > { %p718_p5 = scmp.lt.u32.totalorder %s716_s7, %s712_s8  ;;  %p720_p7 = scmp.lt.u32.totalorder %s712_s8, %s1024_s23 }
  0x68   : > { %p714_p1 = pnand %p713_p0, %p905_p3 }
  0x69   : > { %p719_p6 = por %p718_p5, %p717_p4 }
  0x6a   : > { %p715_p2 = pneg %p714_p1 }
  0x6b   : > { %p721_p8 = por %p720_p7, %p719_p6 }
  0x6d   : > { %p722_p10 = pnand %p721_p8, %p715_p2 }
  0x6f   : > { %725 = shalt.err (!%p722_p10)
}
  0x70   : > { %589 = dma.vmem_to_hbm [thread:$0]  (%p905_p3), %s1057_s6, 128, %s1024_s23, %s369_s11  }
  0x71   : > { %s726_s0 = scalar_lea.vmem %s419_s29, 128  ;;  %s828_s24 = smov [#allocation6]  }
  0x72   : > { %p727_p11 = scmp.ne.s32.totalorder %s419_s29, %s726_s0  ;;  %s730_s13 = sshll.u32 %s828_s24, 4  ;;  %s731_s13 = int_to_ptr.vmem [resolvable:$false] %s730_s13 }
  0x73   : > { %s732_s8 = scalar_lea.vmem %s731_s13, 256  ;;  %p733_p0 = scmp.lt.s32.totalorder %s419_s29, %s731_s13 }
  0x74   : > { %p728_p12 = pnand %p727_p11, %p905_p3  ;;  %p734_p1 = scmp.lt.s32.totalorder %s732_s8, %s726_s0 }
  0x76   : > { %p729_p13 = pneg %p728_p12  ;;  %p735_p2 = por %p734_p1, %p733_p0 }
  0x78   : > { %p736_p4 = pnand %p735_p2, %p729_p13 }
  0x7a   : > { %739 = shalt.err (!%p736_p4)
}
  0x7b   : > { %s740_s9 = scalar_lea.hbm %s1055_s14, 128  ;;  %s744_s11 = scalar_lea.hbm %s1138_s4, 256 }
  0x7c   : > { %p741_p5 = scmp.ne.s32.totalorder %s1055_s14, %s740_s9  ;;  %p745_p8 = scmp.lt.u32.totalorder %s1055_s14, %s1138_s4 }
  0x7d   : > { %p746_p10 = scmp.lt.u32.totalorder %s744_s11, %s740_s9  ;;  %p748_p12 = scmp.lt.u32.totalorder %s740_s9, %s1055_s14 }
  0x7e   : > { %p742_p6 = pnand %p741_p5, %p905_p3 }
  0x7f   : > { %p747_p11 = por %p746_p10, %p745_p8 }
  0x80   : > { %p743_p7 = pneg %p742_p6 }
  0x81   : > { %p749_p13 = por %p748_p12, %p747_p11 }
  0x83   : > { %p750_p0 = pnand %p749_p13, %p743_p7 }
  0x85   : > { %753 = shalt.err (!%p750_p0)
}
  0x86   : > { %s1147_s7 = scalar_lea.sflag [#allocation5], %s1007_s18 }
  0x87   : > { %591 = dma.vmem_to_hbm [thread:$0]  (%p905_p3), %s419_s29, 128, %s1055_s14, %s1147_s7  }
  0x88 PF: > { %p605_p1 = scmp.ge.s32.totalorder %s824_s22, 2  ;;  %s430_s10 = sand.u32 1, %s796_s15  }
  0x89   : > { %s431_s12 = scalar_lea.sflag [#allocation3], %s430_s10 }
  0x8a   : > { %p596_p2 = pnand %p605_p1, %p917_p9 }
  0x8c   : > { %787 = dma.done.wait (!%p596_p2), %s431_s12, 128  }
  0x8d   : > { %789 = vsyncadd (!%p596_p2), %s431_s12, 4294967168  ;;  %s1148_s0 = sadd.s32 4294967294, %s824_s22  }
  0x8e   : > { %s439_s24 = sand.u32 1, %s1148_s0  }
  0x8f   : > { %s440_s13 = scalar_lea.sflag [#allocation5], %s439_s24 }
  0x90   : > { %791 = dma.done.wait (!%p596_p2), %s440_s13, 256  }
  0x91   : > { %793 = vsyncadd (!%p596_p2), %s440_s13, 4294967040  ;;  %s21_s22 = sadd.s32 1, %s824_s22   ;;  %s1149_s15 = smov %s800_s16 }
  0x92   : > { %p18_p3 = scmp.ge.s32.totalorder %s21_s22, 6   ;;  %s1150_s16 = smov %s804_s17 }
  0x93   : > { %s1151_s17 = smov %s925_s5  ;;  %s1152_s18 = smov %s816_s20 }
  0x94   : > { %s1153_s19 = smov %s820_s21  ;;  %s1154_s20 = smov %s1157_s25 }
  0x95   : > { %s1155_s21 = smov %s1161_s26  ;;  %20 = sbr.rel (!%p18_p3) target bundleno = 9 (0x9), region = 106 }
  0x9c   :  { %454 = vsyncpa [#allocation3], 1 }
  0x9d   :  { %456 = vsyncpa [#allocation3 + $0x1], 1 }
  0x9e   :  { %457 = vsyncpa [#allocation5], 1 }
  0x9f   :  { %459 = vsyncpa [#allocation5 + $0x1], 1 }

</bundles_post_ra>
